<compile_context>
chip_gen: v5e
topology: v5e:2x2
jax: 0.10.0
libtpu: 0.0.40
codegen_flags: <defaults>
</compile_context>

<pallas_src>
import jax
import jax.numpy as jnp
import numpy as np
from jax.experimental import pallas as pl
from jax.experimental.pallas import tpu as pltpu

# ---- model dimensions (small, deterministic) --------------------------------
B, CIN, H, W = 2, 4, 16, 16          # input  (PyTorch NCHW: [2, 4, 16, 16])
CENC = 32                            # encoder output channels
NUM_CLASSES = 10                     # classifier output features
KH = KW = 3                          # conv kernel
HW = H * W                           # 256 pixels per image
BHW = B * HW                         # 512 pixels total
PATCH = KH * KW * CIN                # 36 im2col features per pixel


def _forward_kernel(x_ref, wc_ref, bc_ref, wl_ref, bl_ref, mask_ref, pool_ref,
                    o_ref):
    """Full forward pass, one invocation, everything lane-dense.

    x_ref    : [B*CIN, HW]       NCHW input flattened (rows = (b, cin))   VMEM
    wc_ref   : [CENC, PATCH]     conv weight, tap-major columns           VMEM
    bc_ref   : [CENC, 1]         conv bias (broadcasts over lanes)        VMEM
    wl_ref   : [CENC, NCLS]      linear weight transposed                 VMEM
    bl_ref   : [1, NCLS]         linear bias                              VMEM
    mask_ref : [PATCH, B*HW]     precomputed conv boundary masks          VMEM
    pool_ref : [B*HW, B]         precomputed global-average-pool matrix   VMEM
    o_ref    : [B, NCLS]         logits                                   VMEM
    """
    # 1) fold batch onto the lane axis: [B*CIN, HW] -> [CIN, B*HW] = [4, 512].
    #    (aligned lane concat of two sublane slices; rows are now cin only)
    xf = jnp.concatenate(
        [x_ref[b * CIN:(b + 1) * CIN, :] for b in range(B)], axis=1)

    # 2) transposed im2col via 9 static lane rotations; taps stack on sublanes.
    #    Out-of-image (and cross-batch wraparound) reads are killed by the
    #    precomputed mask, so no padded scratch is needed.
    taps = []
    for dy in range(KH):
        for dx in range(KW):
            off = (dy - 1) * W + (dx - 1)            # flat pixel offset of tap
            shift = (-off) % BHW                     # roll[q] = xf[q + off]
            taps.append(xf if shift == 0 else
                        pltpu.roll(xf, shift=shift, axis=1))
    patches = jnp.concatenate(taps, axis=0) * mask_ref[...]       # [36, 512]

    # 3) conv as ONE MXU matmul with pixels on the lane/N axis: [32,36]@[36,512]
    y = jnp.dot(wc_ref[...], patches, preferred_element_type=jnp.float32)
    y = jnp.maximum(y + bc_ref[...], 0.0)                         # [32, 512]

    # 4) global average pool = MXU contraction against the constant pool matrix
    feat = jnp.dot(y, pool_ref[...], preferred_element_type=jnp.float32)  # [32, B]

    # 5) classifier with NO in-kernel transpose: for each batch column, scale
    #    the rows of wl^T by feat[:, b] and sublane-sum -> a [1, NCLS] row.
    rows = [jnp.sum(wl_ref[...] * feat[:, b:b + 1], axis=0, keepdims=True)
            for b in range(B)]
    o_ref[...] = jnp.concatenate(rows, axis=0) + bl_ref[...]      # [B, NCLS]


def prepare_params(w_conv, b_conv, w_cls, b_cls):
    """One-time parameter & constant layout prep (NOT in the per-call path).

    w_conv : [CENC, CIN, KH, KW] (PyTorch Conv2d weight)
    b_conv : [CENC]
    w_cls  : [NUM_CLASSES, CENC] (PyTorch Linear weight)
    b_cls  : [NUM_CLASSES]
    """
    # conv weight -> [CENC, PATCH] with column index (dy*KW + dx)*CIN + cin,
    # matching the in-kernel tap/cin stacking order.
    wc = jnp.transpose(w_conv, (0, 2, 3, 1)).reshape(CENC, PATCH)
    wc = wc.astype(jnp.float32)
    bc = b_conv.reshape(CENC, 1).astype(jnp.float32)
    wl = jnp.transpose(w_cls, (1, 0)).astype(jnp.float32)          # [CENC, NCLS]
    bl = b_cls.reshape(1, NUM_CLASSES).astype(jnp.float32)

    # boundary masks: mask[(t*CIN+cin), b*HW + h*W + w] = 1 iff the 3x3 tap
    # (dy, dx) reads inside the image for output pixel (h, w).
    hh, ww = np.meshgrid(np.arange(H), np.arange(W), indexing="ij")
    blocks = []
    for dy in range(KH):
        for dx in range(KW):
            valid = ((hh + dy - 1 >= 0) & (hh + dy - 1 < H) &
                     (ww + dx - 1 >= 0) & (ww + dx - 1 < W))
            row = np.tile(valid.reshape(HW).astype(np.float32), B)  # [B*HW]
            blocks.append(np.broadcast_to(row, (CIN, BHW)))
    mask = jnp.asarray(np.concatenate(blocks, axis=0), jnp.float32)  # [36, 512]

    # global-average-pool matrix: pool[b*HW + p, b'] = 1/HW * (b == b')
    pool_np = np.kron(np.eye(B, dtype=np.float32),
                      np.ones((HW, 1), np.float32)) / HW             # [512, B]
    pool = jnp.asarray(pool_np, jnp.float32)

    return wc, bc, wl, bl, mask, pool


@jax.jit
def forward(x_nchw, wc, bc, wl, bl, mask, pool):
    """Per-call path: a free contiguous reshape + ONE Pallas kernel launch."""
    # NCHW is already contiguous in (b, cin, h, w) order -> bitcast view.
    x2d = jnp.reshape(x_nchw.astype(jnp.float32), (B * CIN, HW))

    vmem = pl.BlockSpec(memory_space=pltpu.MemorySpace.VMEM)
    return pl.pallas_call(
        _forward_kernel,
        out_shape=jax.ShapeDtypeStruct((B, NUM_CLASSES), jnp.float32),
        in_specs=[vmem] * 7,
        out_specs=vmem,
    )(x2d, wc, bc, wl, bl, mask, pool)


def _reference(x_nchw, w_conv, b_conv, w_cls, b_cls):
    """Pure-JAX reference (mirrors the PyTorch forward) for sanity checking."""
    y = jax.lax.conv_general_dilated(
        x_nchw.astype(jnp.float32), w_conv.astype(jnp.float32),
        window_strides=(1, 1), padding=((1, 1), (1, 1)),
        dimension_numbers=("NCHW", "OIHW", "NCHW"))
    y = y + b_conv.reshape(1, CENC, 1, 1)
    y = jnp.maximum(y, 0.0)
    feat = jnp.mean(y, axis=(2, 3))                   # [B, CENC]
    return feat @ w_cls.T + b_cls[None, :]


if __name__ == "__main__":
    key = jax.random.PRNGKey(0)
    k_x, k_wc, k_bc, k_wl, k_bl = jax.random.split(key, 5)

    x = jax.random.normal(k_x, (B, CIN, H, W), jnp.float32)
    w_conv = jax.random.normal(k_wc, (CENC, CIN, KH, KW), jnp.float32) * 0.1
    b_conv = jax.random.normal(k_bc, (CENC,), jnp.float32) * 0.1
    w_cls = jax.random.normal(k_wl, (NUM_CLASSES, CENC), jnp.float32) * 0.1
    b_cls = jax.random.normal(k_bl, (NUM_CLASSES,), jnp.float32) * 0.1

    # One-time weight / constant layout prep (NOT in the per-forward path).
    params = prepare_params(w_conv, b_conv, w_cls, b_cls)

    out = jax.block_until_ready(forward(x, *params))

    ref = jax.block_until_ready(_reference(x, w_conv, b_conv, w_cls, b_cls))
    assert out.shape == (B, NUM_CLASSES), out.shape
    np.testing.assert_allclose(np.asarray(out), np.asarray(ref),
                               rtol=1e-4, atol=1e-4)

    print("KERNEL_OK")
</pallas_src>

<mosaic_0001>
module attributes {stable_mosaic.version = 11 : i64} {
  func.func @_forward_kernel(%arg0: memref<8x256xf32, #tpu.memory_space<vmem>>, %arg1: memref<32x36xf32, #tpu.memory_space<vmem>>, %arg2: memref<32x1xf32, #tpu.memory_space<vmem>>, %arg3: memref<32x10xf32, #tpu.memory_space<vmem>>, %arg4: memref<1x10xf32, #tpu.memory_space<vmem>>, %arg5: memref<36x512xf32, #tpu.memory_space<vmem>>, %arg6: memref<512x2xf32, #tpu.memory_space<vmem>>, %arg7: memref<2x10xf32, #tpu.memory_space<vmem>>) attributes {dimension_semantics = [], scalar_prefetch = 0 : i64, scratch_operands = 0 : i64, tpu.core_type = #tpu.core_type<tc>} {
    %c0 = arith.constant 0 : index
    %c0_0 = arith.constant 0 : index
    %0 = vector.load %arg0[%c0, %c0_0] : memref<8x256xf32, #tpu.memory_space<vmem>>, vector<4x256xf32>
    %c4 = arith.constant 4 : index
    %c0_1 = arith.constant 0 : index
    %1 = vector.load %arg0[%c4, %c0_1] : memref<8x256xf32, #tpu.memory_space<vmem>>, vector<4x256xf32>
    %2 = tpu.concatenate %0, %1 in 1 : vector<4x256xf32>, vector<4x256xf32> -> vector<4x512xf32>
    %c17_i32 = arith.constant 17 : i32
    %3 = tpu.dynamic_rotate %2 by %c17_i32 dim 1 : vector<4x512xf32>, i32 -> vector<4x512xf32>
    %c16_i32 = arith.constant 16 : i32
    %4 = tpu.dynamic_rotate %2 by %c16_i32 dim 1 : vector<4x512xf32>, i32 -> vector<4x512xf32>
    %c15_i32 = arith.constant 15 : i32
    %5 = tpu.dynamic_rotate %2 by %c15_i32 dim 1 : vector<4x512xf32>, i32 -> vector<4x512xf32>
    %c1_i32 = arith.constant 1 : i32
    %6 = tpu.dynamic_rotate %2 by %c1_i32 dim 1 : vector<4x512xf32>, i32 -> vector<4x512xf32>
    %c511_i32 = arith.constant 511 : i32
    %7 = tpu.dynamic_rotate %2 by %c511_i32 dim 1 : vector<4x512xf32>, i32 -> vector<4x512xf32>
    %c497_i32 = arith.constant 497 : i32
    %8 = tpu.dynamic_rotate %2 by %c497_i32 dim 1 : vector<4x512xf32>, i32 -> vector<4x512xf32>
    %c496_i32 = arith.constant 496 : i32
    %9 = tpu.dynamic_rotate %2 by %c496_i32 dim 1 : vector<4x512xf32>, i32 -> vector<4x512xf32>
    %c495_i32 = arith.constant 495 : i32
    %10 = tpu.dynamic_rotate %2 by %c495_i32 dim 1 : vector<4x512xf32>, i32 -> vector<4x512xf32>
    %11 = tpu.concatenate %3, %4, %5, %6, %2, %7, %8, %9, %10 in 0 : vector<4x512xf32>, vector<4x512xf32>, vector<4x512xf32>, vector<4x512xf32>, vector<4x512xf32>, vector<4x512xf32>, vector<4x512xf32>, vector<4x512xf32>, vector<4x512xf32> -> vector<36x512xf32>
    %c0_2 = arith.constant 0 : index
    %c0_3 = arith.constant 0 : index
    %12 = vector.load %arg5[%c0_2, %c0_3] : memref<36x512xf32, #tpu.memory_space<vmem>>, vector<36x512xf32>
    %13 = arith.mulf %11, %12 : vector<36x512xf32>
    %c0_4 = arith.constant 0 : index
    %c0_5 = arith.constant 0 : index
    %14 = vector.load %arg1[%c0_4, %c0_5] : memref<32x36xf32, #tpu.memory_space<vmem>>, vector<32x36xf32>
    %cst = arith.constant dense<0.000000e+00> : vector<32x512xf32>
    %15 = tpu.matmul %14, %13, %cst {dimension_numbers = #tpu.dot_dimension_numbers<[1], [0], [0], [1], [0, 0, 1, 1], [], []>} : vector<32x36xf32>, vector<36x512xf32>, vector<32x512xf32> -> vector<32x512xf32>
    %c0_6 = arith.constant 0 : index
    %c0_7 = arith.constant 0 : index
    %16 = vector.load %arg2[%c0_6, %c0_7] : memref<32x1xf32, #tpu.memory_space<vmem>>, vector<32x1xf32>
    %17 = vector.broadcast %16 : vector<32x1xf32> to vector<32x512xf32>
    %18 = arith.addf %15, %17 : vector<32x512xf32>
    %cst_8 = arith.constant 0.000000e+00 : f32
    %19 = vector.broadcast %cst_8 : f32 to vector<32x512xf32>
    %20 = arith.maximumf %18, %19 : vector<32x512xf32>
    %c0_9 = arith.constant 0 : index
    %c0_10 = arith.constant 0 : index
    %21 = vector.load %arg6[%c0_9, %c0_10] : memref<512x2xf32, #tpu.memory_space<vmem>>, vector<512x2xf32>
    %cst_11 = arith.constant dense<0.000000e+00> : vector<32x2xf32>
    %22 = tpu.matmul %20, %21, %cst_11 {dimension_numbers = #tpu.dot_dimension_numbers<[1], [0], [0], [1], [0, 0, 1, 1], [], []>} : vector<32x512xf32>, vector<512x2xf32>, vector<32x2xf32> -> vector<32x2xf32>
    %c0_12 = arith.constant 0 : index
    %c0_13 = arith.constant 0 : index
    %23 = vector.load %arg3[%c0_12, %c0_13] : memref<32x10xf32, #tpu.memory_space<vmem>>, vector<32x10xf32>
    %24 = vector.extract_strided_slice %22 {offsets = [0, 0], sizes = [32, 1], strides = [1, 1]} : vector<32x2xf32> to vector<32x1xf32>
    %25 = vector.broadcast %24 : vector<32x1xf32> to vector<32x10xf32>
    %26 = arith.mulf %23, %25 : vector<32x10xf32>
    %cst_14 = arith.constant dense<0.000000e+00> : vector<10xf32>
    %27 = vector.multi_reduction <add>, %26, %cst_14 [0] : vector<32x10xf32> to vector<10xf32>
    %28 = vector.shape_cast %27 : vector<10xf32> to vector<1x10xf32>
    %c0_15 = arith.constant 0 : index
    %c0_16 = arith.constant 0 : index
    %29 = vector.load %arg3[%c0_15, %c0_16] : memref<32x10xf32, #tpu.memory_space<vmem>>, vector<32x10xf32>
    %30 = vector.extract_strided_slice %22 {offsets = [0, 1], sizes = [32, 1], strides = [1, 1]} : vector<32x2xf32> to vector<32x1xf32>
    %31 = vector.broadcast %30 : vector<32x1xf32> to vector<32x10xf32>
    %32 = arith.mulf %29, %31 : vector<32x10xf32>
    %cst_17 = arith.constant dense<0.000000e+00> : vector<10xf32>
    %33 = vector.multi_reduction <add>, %32, %cst_17 [0] : vector<32x10xf32> to vector<10xf32>
    %34 = vector.shape_cast %33 : vector<10xf32> to vector<1x10xf32>
    %35 = tpu.concatenate %28, %34 in 0 : vector<1x10xf32>, vector<1x10xf32> -> vector<2x10xf32>
    %c0_18 = arith.constant 0 : index
    %c0_19 = arith.constant 0 : index
    %36 = vector.load %arg4[%c0_18, %c0_19] : memref<1x10xf32, #tpu.memory_space<vmem>>, vector<1x10xf32>
    %37 = vector.broadcast %36 : vector<1x10xf32> to vector<2x10xf32>
    %38 = arith.addf %35, %37 : vector<2x10xf32>
    %c0_20 = arith.constant 0 : index
    %c0_21 = arith.constant 0 : index
    %39 = vector.load %arg7[%c0_20, %c0_21] : memref<2x10xf32, #tpu.memory_space<vmem>>, vector<2x10xf32>
    tpu.vector_store %arg7[%c0_20, %c0_21], %38 {strides = array<i32>} : memref<2x10xf32, #tpu.memory_space<vmem>>, vector<2x10xf32>,
    return
  }
}

</mosaic_0001>

<bundles_post_ra>
// kernel: forward.1
= control target key start
LH: loop header
LB: loop body
LE: loop exit
PB: predicated region body
PF: predicated region fallthrough
CT: control target
= control target key end

     0   :  { %s1395_s0 = inlined_call_operand.vmem [shape: f32[8,256], index: 0, kind: input, shape index: {}]   ;;  %s1396_s1 = inlined_call_operand.vmem [shape: f32[32,36], index: 1, kind: input, shape index: {}]   ;;  %s1397_s2 = inlined_call_operand.vmem [shape: f32[32,1], index: 2, kind: input, shape index: {}]   ;;  %s1398_s3 = inlined_call_operand.vmem [shape: f32[32,10], index: 3, kind: input, shape index: {}]   ;;  %s1399_s4 = inlined_call_operand.vmem [shape: f32[1,10], index: 4, kind: input, shape index: {}]   ;;  %s1400_s5 = inlined_call_operand.vmem [shape: f32[36,512], index: 5, kind: input, shape index: {}]   ;;  %s1401_s6 = inlined_call_operand.vmem [shape: f32[512,2], index: 6, kind: input, shape index: {}]   ;;  %s1402_s7 = inlined_call_operand.hbm [shape: f32[2,10], index: 7, kind: output, shape index: {}]  }
   0x1   :  { %v29_v0 = vld [vmem:[%s1395_s0] sm:$0xf0] }
   0x2   :  { %v830_v1 = vrot.slane %v29_v0, 4 }
   0x3   :  { %12 = vsyncpa [#allocation3], 0  ;;  %s776_s26 = smov 127   ;;  %s777_s27 = smov 111   ;;  %v30_v2 = vld [vmem:[%s1395_s0 + $0x8] sm:$0xf0]  ;;  %v45_v8 = vlaneseq }
   0x4   :  { %95 = vrot.lane.b32.xlu2 %v830_v1, %s776_s26  ;;  %134 = vrot.lane.b32.xlu1 %v830_v1, %s777_s27  ;;  %s778_s28 = smov 112   ;;  %v841_v3 = vrot.slane %v30_v2, 4  ;;  %v852_v4 = vld [vmem:[%s1395_s0] sm:$0xf]  ;;  %s779_s10 = smov 113   ;;  %vm191_vm2 = vcmask 1043456  }
   0x5   :  { %121 = vrot.lane.b32.xlu0 %v830_v1, %s778_s28  ;;  %v861_v5 = vld [vmem:[%s1395_s0 + $0x8] sm:$0xf]  ;;  %s780_s13 = smov 1   ;;  %s781_s14 = smov 16   ;;  %v897_v11 = vand.u32 127, %v45_v8  ;;  %v222_v25 = vld [vmem:[%s1400_s5 + $0x70] sm:$0xff] }
   0x6   :  { %s782_s15 = smov 15   ;;  %s783_s0 = smov 17   ;;  %v226_v13 = vld [vmem:[%s1400_s5 + $0x90] sm:$0xf]  ;;  %v227_v34 = vld [vmem:[%s1400_s5 + $0x98] sm:$0xf] }
   0x7   :  { %vm138_vm0 = vcmp.lt.s32.totalorder %v897_v11, 111  ;;  %vm99_vm1 = vcmp.lt.s32.totalorder %v897_v11, 127  ;;  %vm125_vm3 = vcmp.lt.s32.totalorder %v897_v11, 112  ;;  %vm112_vm4 = vcmp.lt.s32.totalorder %v897_v11, 113  ;;  %v218_v29 = vld [vmem:[%s1400_s5 + $0x50] sm:$0xff]  ;;  %v223_v41 = vld [vmem:[%s1400_s5 + $0x78] sm:$0xff] }
   0x8   :  { %vm86_vm5 = vcmp.lt.s32.totalorder %v897_v11, 1  ;;  %v219_v49 = vld [vmem:[%s1400_s5 + $0x58] sm:$0xff]  ;;  %vm73_vm6 = vcmp.lt.s32.totalorder %v897_v11, 15  ;;  %v214_v55 = vld [vmem:[%s1400_s5 + $0x30] sm:$0xff]  ;;  %vm60_vm7 = vcmp.lt.s32.totalorder %v897_v11, 16  ;;  %vm47_vm8 = vcmp.lt.s32.totalorder %v897_v11, 17 }
   0x9   :  { %v784_v62 = vmov 0   ;;  %v253_v63 = vld [vmem:[%s1397_s2 + $0x8] sm:$0xff]  ;;  %v210_v2 = vld [vmem:[%s1400_s5 + $0x10] sm:$0xff]  ;;  %vm276_vm9 = vcmask 293888   ;;  %vm641_vm10 = vcmask 80896   ;;  %vm688_vm11 = vcmask 1040384  }
   0xa   :  { %745 = vset.pattern.permute.xlu0 %v784_v62  ;;  %746 = vset.pattern.permute.xlu1 %v784_v62  ;;  %v209_v11 = vld [vmem:[%s1400_s5 + $0x8] sm:$0xff]  ;;  %s786_s23 = smov [#allocation2]   ;;  %vm695_vm12 = vcmask 74752  }
   0xb   :  { %744 = vset.pattern.permute.xlu2 %v784_v62  ;;  %s702_s24 = sshll.u32 %s786_s23, 4  ;;  %s703_s24 = int_to_ptr.vmem [resolvable:$true] %s702_s24 }
   0xc   :  { %97 = vrot.lane.b32.xlu2 %v841_v3, %s776_s26  ;;  %136 = vrot.lane.b32.xlu1 %v841_v3, %s777_s27 }
   0xd   :  { %123 = vrot.lane.b32.xlu0 %v841_v3, %s778_s28 }
  0x14   :  { %110 = vrot.lane.b32.xlu1 %v841_v3, %s779_s10  ;;  %117 = vrot.lane.b32.xlu2 %v852_v4, %s778_s28 }
  0x15   :  { %108 = vrot.lane.b32.xlu0 %v830_v1, %s779_s10 }
  0x1c   :  { %80 = vrot.lane.b32.xlu1 %v861_v5, %s780_s13  ;;  %82 = vrot.lane.b32.xlu2 %v830_v1, %s780_s13 }
  0x1d   :  { %130 = vrot.lane.b32.xlu0 %v852_v4, %s777_s27 }
  0x24   :  { %104 = vrot.lane.b32.xlu1 %v852_v4, %s779_s10  ;;  %54 = vrot.lane.b32.xlu2 %v861_v5, %s781_s14 }
  0x25   :  { %91 = vrot.lane.b32.xlu0 %v852_v4, %s776_s26 }
  0x2c   :  { %67 = vrot.lane.b32.xlu1 %v861_v5, %s782_s15  ;;  %69 = vrot.lane.b32.xlu2 %v830_v1, %s782_s15 }
  0x2d   :  { %56 = vrot.lane.b32.xlu0 %v830_v1, %s781_s14 }
  0x34   :  { %39 = vrot.lane.b32.xlu1 %v861_v5, %s783_s0  ;;  %41 = vrot.lane.b32.xlu2 %v830_v1, %s783_s0 }
  0x35   :  { %84 = vrot.lane.b32.xlu0 %v841_v3, %s780_s13 }
  0x3c   :  { %71 = vrot.lane.b32.xlu1 %v841_v3, %s782_s15  ;;  %43 = vrot.lane.b32.xlu2 %v841_v3, %s783_s0 }
  0x3d   :  { %58 = vrot.lane.b32.xlu0 %v841_v3, %s781_s14 }
  0x44   :  { %132 = vrot.lane.b32.xlu1 %v861_v5, %s777_s27  ;;  %93 = vrot.lane.b32.xlu2 %v861_v5, %s776_s26  ;;  %s704_s27 = sshll.u32 %s1402_s7, 4  ;;  %s705_s27 = int_to_ptr.hbm [resolvable:$true] %s704_s27 }
  0x45   :  { %119 = vrot.lane.b32.xlu0 %v861_v5, %s778_s28 }
  0x4c   :  { %78 = vrot.lane.b32.xlu1 %v852_v4, %s780_s13  ;;  %52 = vrot.lane.b32.xlu2 %v852_v4, %s781_s14 }
  0x4d   :  { %106 = vrot.lane.b32.xlu0 %v861_v5, %s779_s10 }
  0x54   :  { %37 = vrot.lane.b32.xlu1 %v852_v4, %s783_s0 }
  0x55   :  { %65 = vrot.lane.b32.xlu0 %v852_v4, %s782_s15 }
  0x5d   :  { %263 = vperm.xlu0 %745, %v253_v63  }
  0x5e   :  { %v891_v6 = vpop.permute.xlu2 %95 }
  0x66   :  { %v98_v7 = vpop.permute.xlu2 %97 }
  0x67   :  { %v100_v18 = vsel %vm99_vm1, %v891_v6, %v98_v7 }
  0x68   :  { %v173_v21 = vrot.slane %v100_v18, 4 }
  0x6a   :  { %v202_v28 = vsel %vm191_vm2, %v830_v1, %v173_v21  ;;  %v215_v21 = vld [vmem:[%s1400_s5 + $0x38] sm:$0xff] }
  0x6b   :  { %v238_v31 = vmul.f32 %v218_v29, %v202_v28  ;;  %v1036_v29 = vld [vmem:[%s1396_s1 + $0x8] sm:$0xff] }
  0x6e   :  { %v899_v12 = vpop.permute.xlu2 %117 }
  0x76   :  { %v893_v9 = vpop.permute.xlu1 %134  ;;  %v914_v19 = vpop.permute.xlu2 %82 }
  0x77   :  { %v895_v10 = vpop.permute.xlu0 %121 }
  0x7e   :  { %v137_v14 = vpop.permute.xlu1 %136  ;;  %v934_v32 = vpop.permute.xlu2 %54 }
  0x7f   :  { %v139_v15 = vsel %vm138_vm0, %v893_v9, %v137_v14  ;;  %v124_v16 = vpop.permute.xlu0 %123 }
  0x80   :  { %v246_v17 = vmul.f32 %v226_v13, %v139_v15  ;;  %v126_v20 = vsel %vm125_vm3, %v895_v10, %v124_v16  ;;  %v129_v38 = vsel %vm125_vm3, %v124_v16, %v899_v12 }
  0x81   :  { %v185_v23 = vrot.slane %v126_v20, 4  ;;  %v186_v39 = vrot.slane %v129_v38, 4  ;;  %v225_v38 = vld [vmem:[%s1400_s5 + $0x88] sm:$0xf] }
  0x82   :  { %723 = vmatpush.msk.msra.mxu2 %vm191_vm2, %v246_v17  ;;  %v254_v17 = vld [vmem:[%s1397_s2 + $0x10] sm:$0xff] }
  0x83   :  { %268 = vperm.xlu1 %746, %v254_v17  }
  0x86   :  { %v111_v22 = vpop.permute.xlu1 %110  ;;  %v70_v44 = vpop.permute.xlu2 %69 }
  0x87   :  { %v920_v24 = vpop.permute.xlu0 %108 }
  0x88   :  { %v113_v26 = vsel %vm112_vm4, %v920_v24, %v111_v22 }
  0x89   :  { %v206_v27 = vsel %vm191_vm2, %v113_v26, %v185_v23  ;;  %v252_v26 = vld [vmem:[%s1397_s2] sm:$0xff] }
  0x8a   :  { %v242_v30 = vmul.f32 %v222_v25, %v206_v27  ;;  %258 = vperm.xlu2 %744, %v252_v26   ;;  %v255_v26 = vld [vmem:[%s1397_s2 + $0x18] sm:$0xff] }
  0x8c   :  { %371 = vmatpush.msra.mxu2 %v242_v30  ;;  %v211_v30 = vld [vmem:[%s1400_s5 + $0x18] sm:$0xff] }
  0x8e   :  { %372 = vmatpush.msra.mxu2 %v238_v31  ;;  %v936_v33 = vpop.permute.xlu1 %80  ;;  %v42_v60 = vpop.permute.xlu2 %41 }
  0x8f   :  { %v941_v35 = vpop.permute.xlu0 %130  ;;  %v88_v50 = vsel %vm86_vm5, %v936_v33, %v914_v19 }
  0x90   :  { %v142_v36 = vsel %vm138_vm0, %v137_v14, %v941_v35  ;;  %v161_v53 = vrot.slane %v88_v50, 4  ;;  %v1006_v14 = vld [vmem:[%s1396_s1] sm:$0xff] }
  0x91   :  { %v247_v37 = vmul.f32 %v227_v34, %v142_v36 }
  0x92   :  { %273 = vperm.xlu2 %744, %v255_v26   ;;  %v455_v26 = vld [vmem:[%s1401_s6 + $0xb0] sm:$0xff] }
  0x93   :  { %728 = vmatpush.msk.msra.mxu3 %vm191_vm2, %v247_v37  ;;  %v224_v37 = vld [vmem:[%s1400_s5 + $0x80] sm:$0xf] }
  0x96   :  { %v950_v40 = vpop.permute.xlu1 %104  ;;  %v1012_v16 = vpop.permute.xlu2 %43 }
  0x97   :  { %v116_v42 = vsel %vm112_vm4, %v111_v22, %v950_v40  ;;  %v958_v43 = vpop.permute.xlu0 %91  ;;  %v48_v31 = vsel %vm47_vm8, %v42_v60, %v1012_v16 }
  0x98   :  { %v103_v45 = vsel %vm99_vm1, %v98_v7, %v958_v43  ;;  %v207_v46 = vsel %vm191_vm2, %v116_v42, %v186_v39 }
  0x99   :  { %v174_v47 = vrot.slane %v103_v45, 4  ;;  %v243_v48 = vmul.f32 %v223_v41, %v207_v46 }
  0x9b   :  { %400 = vmatpush.msra.mxu3 %v243_v48  ;;  %v203_v51 = vsel %vm191_vm2, %v841_v3, %v174_v47 }
  0x9c   :  { %v239_v52 = vmul.f32 %v219_v49, %v203_v51  ;;  %v1067_v49 = vld [vmem:[%s1396_s1 + $0x10] sm:$0xff] }
  0x9e   :  { %401 = vmatpush.msra.mxu3 %v239_v52  ;;  %v975_v54 = vpop.permute.xlu1 %67  ;;  %v94_v39 = vpop.permute.xlu2 %93 }
  0x9f   :  { %v75_v56 = vsel %vm73_vm6, %v975_v54, %v70_v44  ;;  %v57_v57 = vpop.permute.xlu0 %56  ;;  %v102_v48 = vsel %vm99_vm1, %v958_v43, %v94_v39 }
  0xa0   :  { %v198_v58 = vsel %vm191_vm2, %v75_v56, %v161_v53  ;;  %v62_v61 = vsel %vm60_vm7, %v934_v32, %v57_v57  ;;  %v220_v56 = vld [vmem:[%s1400_s5 + $0x60] sm:$0xff] }
  0xa1   :  { %v234_v59 = vmul.f32 %v214_v55, %v198_v58  ;;  %v149_v0 = vrot.slane %v62_v61, 4 }
  0xa3   :  { %373 = vmatpush.msra.mxu2 %v234_v59 }
  0xa6   :  { %v992_v1 = vpop.permute.xlu1 %39 }
  0xa7   :  { %v49_v3 = vsel %vm47_vm8, %v992_v1, %v42_v60  ;;  %v1000_v7 = vpop.permute.xlu0 %84  ;;  %v216_v60 = vld [vmem:[%s1400_s5 + $0x40] sm:$0xff] }
  0xa8   :  { %v194_v8 = vsel %vm191_vm2, %v49_v3, %v149_v0  ;;  %v87_v15 = vsel %vm86_vm5, %v914_v19, %v1000_v7 }
  0xa9   :  { %v230_v13 = vmul.f32 %v210_v2, %v194_v8  ;;  %v162_v18 = vrot.slane %v87_v15, 4 }
  0xab   :  { %374 = vmatpush.msra.mxu2 %v230_v13 }
  0xac   :  { %724 = vmatmul.msk.f32.vlgmr.msra.gmra.mxu2 %vm276_vm9, %v1006_v14 }
  0xae   :  { %v1019_v20 = vpop.permute.xlu1 %71 }
  0xaf   :  { %v74_v19 = vsel %vm73_vm6, %v70_v44, %v1019_v20  ;;  %v59_v22 = vpop.permute.xlu0 %58 }
  0xb0   :  { %v61_v23 = vsel %vm60_vm7, %v57_v57, %v59_v22  ;;  %v199_v25 = vsel %vm191_vm2, %v74_v19, %v162_v18 }
  0xb1   :  { %v150_v27 = vrot.slane %v61_v23, 4  ;;  %v235_v28 = vmul.f32 %v215_v21, %v199_v25  ;;  %v212_v21 = vld [vmem:[%s1400_s5 + $0x20] sm:$0xff]  ;;  %v213_v25 = vld [vmem:[%s1400_s5 + $0x28] sm:$0xff] }
  0xb3   :  { %402 = vmatpush.msra.mxu3 %v235_v28  ;;  %v195_v34 = vsel %vm191_vm2, %v48_v31, %v150_v27  ;;  %v479_v28 = vld [vmem:[%s1401_s6 + $0x170] sm:$0xff] }
  0xb4   :  { %725 = vmatmul.msk.f32.gmra.mxu2 %vm276_vm9, %v1036_v29  ;;  %v231_v36 = vmul.f32 %v211_v30, %v195_v34 }
  0xb6   :  { %403 = vmatpush.msra.mxu3 %v231_v36  ;;  %v133_v41 = vpop.permute.xlu1 %132  ;;  %v208_v36 = vld [vmem:[%s1400_s5] sm:$0xff] }
  0xb7   :  { %v140_v42 = vsel %vm138_vm0, %v133_v41, %v893_v9  ;;  %v141_v44 = vsel %vm138_vm0, %v941_v35, %v133_v41  ;;  %v120_v45 = vpop.permute.xlu0 %119  ;;  %729 = vmatmul.msk.f32.vlgmr.msra.gmra.mxu3 %vm276_vm9, %v1006_v14  ;;  %v101_v9 = vsel %vm99_vm1, %v94_v39, %v891_v6  ;;  %v171_v35 = vrot.slane %v102_v48, 4  ;;  %v478_v39 = vld [vmem:[%s1401_s6 + $0x168] sm:$0xff]  ;;  %v495_v41 = vld [vmem:[%s1401_s6 + $0x1f0] sm:$0xff]  ;;  %v493_v48 = vld [vmem:[%s1401_s6 + $0x1e0] sm:$0xff] }
  0xb8   :  { %v244_v46 = vmul.f32 %v224_v37, %v141_v44  ;;  %v245_v47 = vmul.f32 %v225_v38, %v140_v42  ;;  %v127_v50 = vsel %vm125_vm3, %v120_v45, %v895_v10  ;;  %v128_v43 = vsel %vm125_vm3, %v899_v12, %v120_v45  ;;  %v221_v10 = vld [vmem:[%s1400_s5 + $0x68] sm:$0xff]  ;;  %v53_v12 = vpop.permute.xlu2 %52  ;;  %v477_v45 = vld [vmem:[%s1401_s6 + $0x160] sm:$0xff] }
  0xb9   :  { %v172_v51 = vrot.slane %v101_v9, 4  ;;  %v183_v53 = vrot.slane %v128_v43, 4  ;;  %v184_v6 = vrot.slane %v127_v50, 4  ;;  %v200_v59 = vsel %vm191_vm2, %v852_v4, %v171_v35  ;;  %v1111_v4 = vld [vmem:[%s1396_s1 + $0x18] sm:$0xff]  ;;  %v475_v9 = vld [vmem:[%s1401_s6 + $0x150] sm:$0xff]  ;;  %v474_v35 = vld [vmem:[%s1401_s6 + $0x148] sm:$0xff] }
  0xba   :  { %713 = vmatpush.msk.msra.mxu0 %vm191_vm2, %v244_v46  ;;  %718 = vmatpush.msk.msra.mxu1 %vm191_vm2, %v245_v47  ;;  %v63_v2 = vsel %vm60_vm7, %v53_v12, %v934_v32  ;;  %v64_v3 = vsel %vm60_vm7, %v59_v22, %v53_v12  ;;  %v236_v8 = vmul.f32 %v216_v60, %v200_v59  ;;  %v494_v46 = vld [vmem:[%s1401_s6 + $0x1e8] sm:$0xff]  ;;  %v476_v47 = vld [vmem:[%s1401_s6 + $0x158] sm:$0xff]  ;;  %v473_v50 = vld [vmem:[%s1401_s6 + $0x140] sm:$0xff] }
  0xbb   :  { %v201_v63 = vsel %vm191_vm2, %v861_v5, %v172_v51  ;;  %v148_v17 = vrot.slane %v63_v2, 4  ;;  %v147_v32 = vrot.slane %v64_v3, 4  ;;  %v491_v43 = vld [vmem:[%s1401_s6 + $0x1d0] sm:$0xff]  ;;  %v472_v51 = vld [vmem:[%s1401_s6 + $0x138] sm:$0xff]  ;;  %v461_v2 = vld [vmem:[%s1401_s6 + $0xe0] sm:$0xff] }
  0xbc   :  { %726 = vmatmul.msk.f32.gmra.mxu2 %vm276_vm9, %v1067_v49  ;;  %v448_v12 = vld [vmem:[%s1401_s6 + $0x78] sm:$0xff]  ;;  %v487_v59 = vld [vmem:[%s1401_s6 + $0x1b0] sm:$0xff] }
  0xbd   :  { %v447_v60 = vld [vmem:[%s1401_s6 + $0x70] sm:$0xff]  ;;  %v484_v3 = vld [vmem:[%s1401_s6 + $0x198] sm:$0xff] }
  0xbe   :  { %v79_v52 = vpop.permute.xlu1 %78 }
  0xbf   :  { %v107_v55 = vpop.permute.xlu0 %106  ;;  %730 = vmatmul.msk.f32.gmra.mxu3 %vm276_vm9, %v1036_v29  ;;  %v89_v5 = vsel %vm86_vm5, %v79_v52, %v936_v33  ;;  %v90_v13 = vsel %vm86_vm5, %v1000_v7, %v79_v52  ;;  %v490_v52 = vld [vmem:[%s1401_s6 + $0x1c8] sm:$0xff] }
  0xc0   :  { %v114_v57 = vsel %vm112_vm4, %v107_v55, %v920_v24  ;;  %v115_v58 = vsel %vm112_vm4, %v950_v40, %v107_v55  ;;  %v217_v24 = vld [vmem:[%s1400_s5 + $0x48] sm:$0xff]  ;;  %v159_v33 = vrot.slane %v90_v13, 4  ;;  %v160_v19 = vrot.slane %v89_v5, 4  ;;  %v469_v55 = vld [vmem:[%s1401_s6 + $0x120] sm:$0xff]  ;;  %v460_v5 = vld [vmem:[%s1401_s6 + $0xd8] sm:$0xff] }
  0xc1   :  { %v204_v61 = vsel %vm191_vm2, %v115_v58, %v183_v53  ;;  %v205_v62 = vsel %vm191_vm2, %v114_v57, %v184_v6  ;;  %v237_v15 = vmul.f32 %v217_v24, %v201_v63  ;;  %v471_v53 = vld [vmem:[%s1401_s6 + $0x130] sm:$0xff]  ;;  %v489_v6 = vld [vmem:[%s1401_s6 + $0x1c0] sm:$0xff]  ;;  %v464_v57 = vld [vmem:[%s1401_s6 + $0xf8] sm:$0xff] }
  0xc2   :  { %v240_v0 = vmul.f32 %v220_v56, %v204_v61  ;;  %v241_v40 = vmul.f32 %v221_v10, %v205_v62  ;;  %v468_v56 = vld [vmem:[%s1401_s6 + $0x118] sm:$0xff]  ;;  %v467_v10 = vld [vmem:[%s1401_s6 + $0x110] sm:$0xff]  ;;  %v466_v58 = vld [vmem:[%s1401_s6 + $0x108] sm:$0xff] }
  0xc3   :  { %v463_v61 = vld [vmem:[%s1401_s6 + $0xf0] sm:$0xff]  ;;  %v465_v62 = vld [vmem:[%s1401_s6 + $0x100] sm:$0xff]  ;;  %v486_v63 = vld [vmem:[%s1401_s6 + $0x1a8] sm:$0xff] }
  0xc4   :  { %313 = vmatpush.msra.mxu0 %v240_v0  ;;  %342 = vmatpush.msra.mxu1 %v241_v40  ;;  %v446_v24 = vld [vmem:[%s1401_s6 + $0x68] sm:$0xff]  ;;  %v485_v40 = vld [vmem:[%s1401_s6 + $0x1a0] sm:$0xff]  ;;  %v483_v13 = vld [vmem:[%s1401_s6 + $0x190] sm:$0xff] }
  0xc5   :  { %727 = vmatmul.msk.f32.gmra.mxu2 %vm276_vm9, %v1111_v4  ;;  %v462_v0 = vld [vmem:[%s1401_s6 + $0xe8] sm:$0xff] }
  0xc6   :  { %314 = vmatpush.msra.mxu0 %v236_v8  ;;  %343 = vmatpush.msra.mxu1 %v237_v15  ;;  %v38_v18 = vpop.permute.xlu1 %37  ;;  %v444_v8 = vld [vmem:[%s1401_s6 + $0x58] sm:$0xff]  ;;  %v443_v15 = vld [vmem:[%s1401_s6 + $0x50] sm:$0xff] }
  0xc7   :  { %v50_v7 = vsel %vm47_vm8, %v38_v18, %v992_v1  ;;  %v51_v22 = vsel %vm47_vm8, %v1012_v16, %v38_v18  ;;  %v66_v23 = vpop.permute.xlu0 %65  ;;  %731 = vmatmul.msk.f32.gmra.mxu3 %vm276_vm9, %v1067_v49  ;;  %v480_v1 = vld [vmem:[%s1401_s6 + $0x178] sm:$0xff]  ;;  %v442_v18 = vld [vmem:[%s1401_s6 + $0x48] sm:$0xff] }
  0xc8   :  { %v76_v16 = vsel %vm73_vm6, %v66_v23, %v975_v54  ;;  %v77_v27 = vsel %vm73_vm6, %v1019_v20, %v66_v23  ;;  %v192_v34 = vsel %vm191_vm2, %v51_v22, %v147_v32  ;;  %v193_v54 = vsel %vm191_vm2, %v50_v7, %v148_v17  ;;  %555 = vmatpush.msrb.mxu2 %v480_v1  ;;  %v496_v20 = vld [vmem:[%s1401_s6 + $0x1f8] sm:$0xff]  ;;  %v459_v17 = vld [vmem:[%s1401_s6 + $0xd0] sm:$0xff]  ;;  %v482_v32 = vld [vmem:[%s1401_s6 + $0x188] sm:$0xff] }
  0xc9   :  { %v196_v30 = vsel %vm191_vm2, %v77_v27, %v159_v33  ;;  %v197_v31 = vsel %vm191_vm2, %v76_v16, %v160_v19  ;;  %584 = vmatpush.msrb.mxu3 %v496_v20  ;;  %v228_v42 = vmul.f32 %v208_v36, %v192_v34  ;;  %v229_v44 = vmul.f32 %v209_v11, %v193_v54  ;;  %v481_v33 = vld [vmem:[%s1401_s6 + $0x180] sm:$0xff]  ;;  %v440_v22 = vld [vmem:[%s1401_s6 + $0x38] sm:$0xff]  ;;  %v438_v1 = vld [vmem:[%s1401_s6 + $0x28] sm:$0xff] }
  0xca   :  { %v232_v37 = vmul.f32 %v212_v21, %v196_v30  ;;  %v233_v38 = vmul.f32 %v213_v25, %v197_v31  ;;  %556 = vmatpush.msrb.mxu2 %v479_v28  ;;  %v458_v21 = vld [vmem:[%s1401_s6 + $0xc8] sm:$0xff]  ;;  %v441_v19 = vld [vmem:[%s1401_s6 + $0x40] sm:$0xff]  ;;  %v456_v23 = vld [vmem:[%s1401_s6 + $0xb8] sm:$0xff] }
  0xcb   :  { %585 = vmatpush.msrb.mxu3 %v495_v41  ;;  %v457_v7 = vld [vmem:[%s1401_s6 + $0xc0] sm:$0xff]  ;;  %v439_v25 = vld [vmem:[%s1401_s6 + $0x30] sm:$0xff]  ;;  %v454_v16 = vld [vmem:[%s1401_s6 + $0xa8] sm:$0xff] }
  0xcc   :  { %315 = vmatpush.msra.mxu0 %v232_v37  ;;  %344 = vmatpush.msra.mxu1 %v233_v38  ;;  %v437_v27 = vld [vmem:[%s1401_s6 + $0x20] sm:$0xff]  ;;  %v436_v30 = vld [vmem:[%s1401_s6 + $0x18] sm:$0xff]  ;;  %v435_v34 = vld [vmem:[%s1401_s6 + $0x10] sm:$0xff] }
  0xcd   :  { %557 = vmatpush.msrb.mxu2 %v478_v39  ;;  %586 = vmatpush.msrb.mxu3 %v494_v46  ;;  %v453_v28 = vld [vmem:[%s1401_s6 + $0xa0] sm:$0xff]  ;;  %v452_v31 = vld [vmem:[%s1401_s6 + $0x98] sm:$0xff]  ;;  %v451_v36 = vld [vmem:[%s1401_s6 + $0x90] sm:$0xff] }
  0xce   :  { %316 = vmatpush.msra.mxu0 %v228_v42  ;;  %345 = vmatpush.msra.mxu1 %v229_v44  ;;  %v434_v11 = vld [vmem:[%s1401_s6 + $0x8] sm:$0xff]  ;;  %v433_v38 = vld [vmem:[%s1401_s6] sm:$0xff] }
  0xcf   :  { %714 = vmatmul.msk.f32.vlgmr.msra.gmra.mxu0 %vm276_vm9, %v1006_v14  ;;  %719 = vmatmul.msk.f32.vlgmr.msra.gmra.mxu1 %vm276_vm9, %v1006_v14  ;;  %v492_v14 = vld [vmem:[%s1401_s6 + $0x1d8] sm:$0xff]  ;;  %v450_v20 = vld [vmem:[%s1401_s6 + $0x88] sm:$0xff]  ;;  %v449_v39 = vld [vmem:[%s1401_s6 + $0x80] sm:$0xff]  ;;  %v264_v44 = vpop.permute.xlu0 %263 }
  0xd0   :  { %732 = vmatmul.msk.f32.gmra.mxu3 %vm276_vm9, %v1111_v4  ;;  %558 = vmatpush.msrb.mxu2 %v477_v45 }
  0xd1   :  { %587 = vmatpush.msrb.mxu3 %v493_v48  ;;  %497 = vmatpush.msrb.mxu0 %v448_v12 }
  0xd2   :  { %559 = vmatpush.msrb.mxu2 %v476_v47  ;;  %526 = vmatpush.msrb.mxu1 %v464_v57 }
  0xd3   :  { %588 = vmatpush.msrb.mxu3 %v492_v14  ;;  %498 = vmatpush.msrb.mxu0 %v447_v60 }
  0xd4   :  { %560 = vmatpush.msrb.mxu2 %v475_v9  ;;  %527 = vmatpush.msrb.mxu1 %v463_v61 }
  0xd5   :  { %589 = vmatpush.msrb.mxu3 %v491_v43  ;;  %499 = vmatpush.msrb.mxu0 %v446_v24 }
  0xd6   :  { %561 = vmatpush.msrb.mxu2 %v474_v35  ;;  %528 = vmatpush.msrb.mxu1 %v462_v0 }
  0xd7   :  { %715 = vmatmul.msk.f32.gmra.mxu0 %vm276_vm9, %v1036_v29  ;;  %720 = vmatmul.msk.f32.gmra.mxu1 %vm276_vm9, %v1036_v29  ;;  %v470_v29 = vld [vmem:[%s1401_s6 + $0x128] sm:$0xff] }
  0xd8   :  { %562 = vmatpush.msrb.mxu2 %v473_v50  ;;  %590 = vmatpush.msrb.mxu3 %v490_v52 }
  0xd9   :  { %529 = vmatpush.msrb.mxu1 %v461_v2 }
  0xda   :  { %563 = vmatpush.msrb.mxu2 %v472_v51  ;;  %591 = vmatpush.msrb.mxu3 %v489_v6 }
  0xdb   :  { %530 = vmatpush.msrb.mxu1 %v460_v5 }
  0xdc   :  { %564 = vmatpush.msrb.mxu2 %v471_v53 }
  0xdd   :  { %531 = vmatpush.msrb.mxu1 %v459_v17 }
  0xde   :  { %565 = vmatpush.msrb.mxu2 %v470_v29 }
  0xdf   :  { %716 = vmatmul.msk.f32.gmra.mxu0 %vm276_vm9, %v1067_v49  ;;  %721 = vmatmul.msk.f32.gmra.mxu1 %vm276_vm9, %v1067_v49  ;;  %v488_v49 = vld [vmem:[%s1401_s6 + $0x1b8] sm:$0xff] }
  0xe0   :  { %566 = vmatpush.msrb.mxu2 %v469_v55  ;;  %592 = vmatpush.msrb.mxu3 %v488_v49 }
  0xe1   :  { %532 = vmatpush.msrb.mxu1 %v458_v21 }
  0xe2   :  { %567 = vmatpush.msrb.mxu2 %v468_v56  ;;  %593 = vmatpush.msrb.mxu3 %v487_v59 }
  0xe3   :  { %533 = vmatpush.msrb.mxu1 %v457_v7 }
  0xe4   :  { %568 = vmatpush.msrb.mxu2 %v467_v10  ;;  %594 = vmatpush.msrb.mxu3 %v486_v63  ;;  %v259_v54 = vpop.permute.xlu2 %258 }
  0xe5   :  { %534 = vmatpush.msrb.mxu1 %v456_v23 }
  0xe6   :  { %569 = vmatpush.msrb.mxu2 %v466_v58  ;;  %595 = vmatpush.msrb.mxu3 %v485_v40 }
  0xe7   :  { %717 = vmatmul.msk.f32.gmra.mxu0 %vm276_vm9, %v1111_v4  ;;  %722 = vmatmul.msk.f32.gmra.mxu1 %vm276_vm9, %v1111_v4  ;;  %v445_v4 = vld [vmem:[%s1401_s6 + $0x60] sm:$0xff] }
  0xe8   :  { %570 = vmatpush.msrb.mxu2 %v465_v62  ;;  %500 = vmatpush.msrb.mxu0 %v445_v4 }
  0xe9   :  { %596 = vmatpush.msrb.mxu3 %v484_v3  ;;  %535 = vmatpush.msrb.mxu1 %v455_v26 }
  0xea   :  { %501 = vmatpush.msrb.mxu0 %v444_v8 }
  0xeb   :  { %597 = vmatpush.msrb.mxu3 %v483_v13  ;;  %536 = vmatpush.msrb.mxu1 %v454_v16 }
  0xec   :  { %502 = vmatpush.msrb.mxu0 %v443_v15  ;;  %v274_v29 = vpop.permute.xlu2 %273 }
  0xed   :  { %598 = vmatpush.msrb.mxu3 %v482_v32  ;;  %537 = vmatpush.msrb.mxu1 %v453_v28 }
  0xee   :  { %503 = vmatpush.msrb.mxu0 %v442_v18 }
  0xef   :  { %599 = vmatpush.msrb.mxu3 %v481_v33  ;;  %538 = vmatpush.msrb.mxu1 %v452_v31 }
  0xf0   :  { %504 = vmatpush.msrb.mxu0 %v441_v19 }
  0xf1   :  { %539 = vmatpush.msrb.mxu1 %v451_v36 }
  0xf2   :  { %505 = vmatpush.msrb.mxu0 %v440_v22 }
  0xf3   :  { %540 = vmatpush.msrb.mxu1 %v450_v20 }
  0xf4   :  { %506 = vmatpush.msrb.mxu0 %v439_v25 }
  0xf5   :  { %541 = vmatpush.msrb.mxu1 %v449_v39  ;;  %v269_v35 = vpop.permute.xlu1 %268 }
  0xf6   :  { %507 = vmatpush.msrb.mxu0 %v438_v1  ;;  %v785_v1 = vmov 1  }
  0xf7   :  { %747 = vset.pattern.permute.xlu0 %v785_v1 }
  0xf8   :  { %508 = vmatpush.msrb.mxu0 %v437_v27 }
  0xfa   :  { %509 = vmatpush.msrb.mxu0 %v436_v30 }
  0xfc   :  { %510 = vmatpush.msrb.mxu0 %v435_v34 }
  0xfe   :  { %511 = vmatpush.msrb.mxu0 %v434_v11 }
 0x100   :  { %512 = vmatpush.msrb.mxu0 %v433_v38 }
 0x12f   :  { %v376_v37 = vpop.f32.mrf.mxu2 }
 0x130   :  { %v377_v41 = vadd.f32 %v376_v37, %v259_v54 }
 0x132   :  { %v419_v42 = vmax.f32 %v377_v41, 0.0 }
 0x134   :  { %571 = vmatmul.f32.vlgmr.msrb.gmra.mxu2 %v419_v42 }
 0x137   :  { %v379_v45 = vpop.f32.mrf.mxu2 }
 0x138   :  { %v380_v46 = vadd.f32 %v379_v45, %v264_v44 }
 0x13a   :  { %v423_v47 = vmax.f32 %v380_v46, 0.0  ;;  %v405_v48 = vpop.f32.mrf.mxu3 }
 0x13b   :  { %v406_v9 = vadd.f32 %v405_v48, %v259_v54 }
 0x13c   :  { %574 = vmatmul.f32.gmra.mxu2 %v423_v47 }
 0x13d   :  { %v420_v14 = vmax.f32 %v406_v9, 0.0 }
 0x13f   :  { %600 = vmatmul.f32.vlgmr.msrb.gmra.mxu3 %v420_v14  ;;  %v382_v50 = vpop.f32.mrf.mxu2 }
 0x140   :  { %v383_v43 = vadd.f32 %v382_v50, %v269_v35 }
 0x142   :  { %v427_v51 = vmax.f32 %v383_v43, 0.0  ;;  %v408_v52 = vpop.f32.mrf.mxu3 }
 0x143   :  { %v409_v53 = vadd.f32 %v408_v52, %v264_v44 }
 0x144   :  { %577 = vmatmul.f32.gmra.mxu2 %v427_v51 }
 0x145   :  { %v424_v6 = vmax.f32 %v409_v53, 0.0 }
 0x147   :  { %603 = vmatmul.f32.gmra.mxu3 %v424_v6 }
 0x148   :  { %v385_v55 = vpop.f32.mrf.mxu2 }
 0x149   :  { %v386_v56 = vadd.f32 %v385_v55, %v274_v29  ;;  %v613_v55 = vld [vmem:[%s1398_s3] sm:$0xff] }
 0x14a   :  { %v411_v10 = vpop.f32.mrf.mxu3 }
 0x14b   :  { %v412_v49 = vadd.f32 %v411_v10, %v269_v35  ;;  %v431_v12 = vmax.f32 %v386_v56, 0.0  ;;  %v614_v56 = vld [vmem:[%s1398_s3 + $0x8] sm:$0xff] }
 0x14c   :  { %v318_v57 = vpop.f32.mrf.mxu0  ;;  %v347_v58 = vpop.f32.mrf.mxu1 }
 0x14d   :  { %v428_v59 = vmax.f32 %v412_v49, 0.0  ;;  %v319_v60 = vadd.f32 %v318_v57, %v259_v54  ;;  %v348_v61 = vadd.f32 %v347_v58, %v259_v54  ;;  %580 = vmatmul.f32.gmra.mxu2 %v431_v12  ;;  %v615_v57 = vld [vmem:[%s1398_s3 + $0x10] sm:$0xff] }
 0x14f   :  { %v417_v62 = vmax.f32 %v319_v60, 0.0  ;;  %v418_v63 = vmax.f32 %v348_v61, 0.0  ;;  %606 = vmatmul.f32.gmra.mxu3 %v428_v59 }
 0x151   :  { %513 = vmatmul.f32.vlgmr.msrb.gmra.mxu0 %v417_v62  ;;  %542 = vmatmul.f32.vlgmr.msrb.gmra.mxu1 %v418_v63  ;;  %v616_v62 = vld [vmem:[%s1398_s3 + $0x18] sm:$0xff] }
 0x153   :  { %v414_v24 = vpop.f32.mrf.mxu3 }
 0x154   :  { %v415_v0 = vadd.f32 %v414_v24, %v274_v29  ;;  %v321_v40 = vpop.f32.mrf.mxu0  ;;  %v350_v4 = vpop.f32.mrf.mxu1 }
 0x155   :  { %v322_v2 = vadd.f32 %v321_v40, %v264_v44  ;;  %v351_v3 = vadd.f32 %v350_v4, %v264_v44 }
 0x156   :  { %v432_v8 = vmax.f32 %v415_v0, 0.0 }
 0x157   :  { %v421_v5 = vmax.f32 %v322_v2, 0.0  ;;  %v422_v13 = vmax.f32 %v351_v3, 0.0 }
 0x158   :  { %609 = vmatmul.f32.gmra.mxu3 %v432_v8 }
 0x159   :  { %516 = vmatmul.f32.gmra.mxu0 %v421_v5  ;;  %545 = vmatmul.f32.gmra.mxu1 %v422_v13 }
 0x15c   :  { %v324_v15 = vpop.f32.mrf.mxu0  ;;  %v353_v17 = vpop.f32.mrf.mxu1 }
 0x15d   :  { %v325_v32 = vadd.f32 %v324_v15, %v269_v35  ;;  %v354_v18 = vadd.f32 %v353_v17, %v269_v35 }
 0x15f   :  { %v425_v21 = vmax.f32 %v325_v32, 0.0  ;;  %v426_v33 = vmax.f32 %v354_v18, 0.0 }
 0x161   :  { %519 = vmatmul.f32.gmra.mxu0 %v425_v21  ;;  %548 = vmatmul.f32.gmra.mxu1 %v426_v33 }
 0x164   :  { %v327_v19 = vpop.f32.mrf.mxu0  ;;  %v356_v7 = vpop.f32.mrf.mxu1 }
 0x165   :  { %v328_v22 = vadd.f32 %v327_v19, %v274_v29  ;;  %v357_v23 = vadd.f32 %v356_v7, %v274_v29 }
 0x167   :  { %v429_v25 = vmax.f32 %v328_v22, 0.0  ;;  %v430_v26 = vmax.f32 %v357_v23, 0.0 }
 0x169   :  { %522 = vmatmul.f32.gmra.mxu0 %v429_v25  ;;  %551 = vmatmul.f32.gmra.mxu1 %v430_v26 }
 0x1b7   :  { %v572_v16 = vpop.f32.mrf.mxu2 }
 0x1bf   :  { %v575_v36 = vpop.f32.mrf.mxu2 }
 0x1c2   :  { %v601_v27 = vpop.f32.mrf.mxu3 }
 0x1c7   :  { %v578_v42 = vpop.f32.mrf.mxu2 }
 0x1ca   :  { %v604_v11 = vpop.f32.mrf.mxu3 }
 0x1ce   :  { %v514_v28 = vpop.f32.mrf.mxu0  ;;  %v543_v30 = vpop.f32.mrf.mxu1 }
 0x1cf   :  { %v544_v31 = vadd.f32 %v543_v30, %v514_v28 }
 0x1d0   :  { %v581_v43 = vpop.f32.mrf.mxu2 }
 0x1d1   :  { %v573_v34 = vadd.f32 %v572_v16, %v544_v31 }
 0x1d2   :  { %v607_v47 = vpop.f32.mrf.mxu3 }
 0x1d3   :  { %v602_v54 = vadd.f32 %v601_v27, %v573_v34 }
 0x1d5   :  { %656 = vperm.xlu0 %747, %v602_v54   ;;  %619 = vperm.xlu1 %746, %v602_v54  }
 0x1d6   :  { %v517_v20 = vpop.f32.mrf.mxu0  ;;  %v546_v37 = vpop.f32.mrf.mxu1 }
 0x1d7   :  { %v547_v38 = vadd.f32 %v546_v37, %v517_v20 }
 0x1d9   :  { %v576_v39 = vadd.f32 %v575_v36, %v547_v38 }
 0x1db   :  { %v605_v41 = vadd.f32 %v604_v11, %v576_v39  ;;  %v610_v52 = vpop.f32.mrf.mxu3  ;;  %v749_v11 = vld [vmem:[%s1399_s4] ss:$0 sm:$0xff] }
 0x1dd   :  { %748 = vset.pattern.permute.xlu1 %v785_v1  ;;  %624 = vperm.xlu2 %744, %v605_v41  }
 0x1de   :  { %v549_v44 = vpop.f32.mrf.mxu1  ;;  %660 = vperm.xlu1 %748, %v605_v41   ;;  %v520_v45 = vpop.f32.mrf.mxu0 }
 0x1df   :  { %v550_v46 = vadd.f32 %v549_v44, %v520_v45 }
 0x1e1   :  { %v579_v48 = vadd.f32 %v578_v42, %v550_v46 }
 0x1e3   :  { %v608_v9 = vadd.f32 %v607_v47, %v579_v48 }
 0x1e5   :  { %629 = vperm.xlu2 %744, %v608_v9  }
 0x1e6   :  { %664 = vperm.xlu1 %748, %v608_v9   ;;  %v523_v14 = vpop.f32.mrf.mxu0  ;;  %v552_v35 = vpop.f32.mrf.mxu1 }
 0x1e7   :  { %v553_v50 = vadd.f32 %v552_v35, %v523_v14 }
 0x1e9   :  { %v582_v51 = vadd.f32 %v581_v43, %v553_v50 }
 0x1eb   :  { %v611_v53 = vadd.f32 %v610_v52, %v582_v51 }
 0x1ed   :  { %668 = vperm.xlu0 %747, %v611_v53   ;;  %634 = vperm.xlu2 %744, %v611_v53  }
 0x237   :  { %v625_v6 = vpop.permute.xlu2 %624 }
 0x238   :  { %v638_v12 = vmul.f32 %v625_v6, %v614_v56 }
 0x23a   :  { %v643_v59 = vsel %vm641_vm10, %v638_v12, 0.0 }
 0x23f   :  { %v630_v29 = vpop.permute.xlu2 %629 }
 0x240   :  { %v639_v60 = vmul.f32 %v630_v29, %v615_v57 }
 0x242   :  { %v645_v0 = vsel %vm641_vm10, %v639_v60, 0.0 }
 0x247   :  { %v620_v10 = vpop.permute.xlu1 %619  ;;  %v635_v63 = vpop.permute.xlu2 %634 }
 0x248   :  { %v637_v49 = vmul.f32 %v620_v10, %v613_v55  ;;  %v640_v40 = vmul.f32 %v635_v63, %v616_v62  ;;  %v657_v3 = vpop.permute.xlu0 %656 }
 0x249   :  { %v671_v15 = vmul.f32 %v657_v3, %v613_v55 }
 0x24a   :  { %v642_v58 = vsel %vm641_vm10, %v637_v49, 0.0  ;;  %v647_v2 = vsel %vm641_vm10, %v640_v40, 0.0 }
 0x24b   :  { %v644_v61 = vadd.f32 %v643_v59, %v642_v58  ;;  %v675_v21 = vsel %vm641_vm10, %v671_v15, 0.0 }
 0x24d   :  { %v646_v4 = vadd.f32 %v645_v0, %v644_v61 }
 0x24f   :  { %v648_v8 = vadd.f32 %v647_v2, %v646_v4 }
 0x250   :  { %v661_v24 = vpop.permute.xlu1 %660 }
 0x251   :  { %v672_v5 = vmul.f32 %v661_v24, %v614_v56  ;;  %v649_v32 = vrot.slane %v648_v8, 4 }
 0x253   :  { %v676_v18 = vsel %vm641_vm10, %v672_v5, 0.0  ;;  %v650_v19 = vadd.f32 %v649_v32, %v648_v8 }
 0x254   :  { %v677_v7 = vadd.f32 %v676_v18, %v675_v21 }
 0x255   :  { %v651_v1 = vrot.slane %v650_v19, 2 }
 0x257   :  { %v652_v28 = vadd.f32 %v651_v1, %v650_v19 }
 0x258   :  { %v665_v13 = vpop.permute.xlu1 %664 }
 0x259   :  { %v673_v17 = vmul.f32 %v665_v13, %v615_v57  ;;  %v653_v34 = vrot.slane %v652_v28, 1 }
 0x25b   :  { %v678_v33 = vsel %vm641_vm10, %v673_v17, 0.0  ;;  %v654_v20 = vadd.f32 %v653_v34, %v652_v28 }
 0x25c   :  { %v679_v25 = vadd.f32 %v678_v33, %v677_v7 }
 0x25f   :  { %v669_v22 = vpop.permute.xlu0 %668 }
 0x260   :  { %v674_v23 = vmul.f32 %v669_v22, %v616_v62 }
 0x262   :  { %v680_v26 = vsel %vm641_vm10, %v674_v23, 0.0 }
 0x263   :  { %v681_v16 = vadd.f32 %v680_v26, %v679_v25 }
 0x265   :  { %v682_v27 = vrot.slane %v681_v16, 4 }
 0x267   :  { %v683_v30 = vadd.f32 %v682_v27, %v681_v16 }
 0x269   :  { %v684_v31 = vrot.slane %v683_v30, 2 }
 0x26b   :  { %v685_v36 = vadd.f32 %v684_v31, %v683_v30 }
 0x26d   :  { %v686_v54 = vrot.slane %v685_v36, 1 }
 0x26f   :  { %v687_v37 = vadd.f32 %v686_v54, %v685_v36 }
 0x271   :  { %v689_v38 = vsel %vm688_vm11, %v654_v20, %v687_v37 }
 0x272   :  { %v694_v39 = vadd.f32 %v749_v11, %v689_v38 }
 0x274   :  { %696 = vst.msk [vmem:[#allocation2] sm:$0x3] %vm695_vm12, %v694_v39 }
 0x275   :  { %707 = dma.vmem_to_hbm [thread:$0]  %s703_s24, 32, %s705_s27, [#allocation3]  }
 0x276   :  { %774 = dma.done.wait [#allocation3], 32  }
 0x277   :  { %775 = vsyncadd [#allocation3], 4294967264 }
 0x278   :  { %712 = vsyncpa [#allocation3], 1 }

</bundles_post_ra>
